<compile_context>
chip_gen: v6e
topology: v6e:2x2x1
jax: 0.10.0
libtpu: 0.0.40
codegen_flags: <defaults>
</compile_context>

<pallas_src>
import functools
import math

import jax
import jax.numpy as jnp
from jax.experimental import pallas as pl
from jax.experimental.pallas import tpu as pltpu

_BN_EPS = 1e-5
_PAR1 = pltpu.CompilerParams(dimension_semantics=("parallel",))


def _round_up(x, m):
    return ((x + m - 1) // m) * m


# ----------------------------------------------------------------------------
# Pallas kernel bodies
# ----------------------------------------------------------------------------
def _mm_bias_kernel(x_ref, w_ref, b_ref, o_ref, *, relu):
    """o = [relu](x @ w + b)   (1x1 conv with BN folded into w/b)."""
    y = jnp.dot(x_ref[...], w_ref[...], preferred_element_type=jnp.float32)
    y = y + b_ref[...]
    if relu:
        y = jnp.maximum(y, 0.0)
    o_ref[...] = y.astype(o_ref.dtype)


def _conv3x3_gap_kernel(xp_ref, w_ref, b_ref, o_ref, gap_ref, *, stride, Ho, Wo):
    """3x3 conv (BN folded) + relu for one image, accumulated over the 9 taps
    in-kernel (no HBM im2col), with a fused global-average-pool output.

    xp_ref : (stride*stride, Hq, Wq, C)  stride-phase-split, 1-padded input
    w_ref  : (9, C, Cout)                per-tap weights (bf16, BN-scaled)
    b_ref  : (1, Cout)
    o_ref  : (1, Ho*Wo, Cout)            bf16
    gap_ref: (1, 1, Cout)                f32
    """
    x = xp_ref[...]
    C = x.shape[-1]
    Cout = w_ref.shape[-1]
    acc = jnp.zeros((Ho * Wo, Cout), jnp.float32)
    for kh in range(3):
        ph, ih = kh % stride, kh // stride
        for kw in range(3):
            pw, iw = kw % stride, kw // stride
            win = x[ph * stride + pw, ih:ih + Ho, iw:iw + Wo, :]
            win = win.reshape(Ho * Wo, C)
            acc = acc + jnp.dot(win, w_ref[3 * kh + kw],
                                preferred_element_type=jnp.float32)
    y = jnp.maximum(acc + b_ref[...], 0.0)
    o_ref[0] = y.astype(o_ref.dtype)
    gap_ref[0] = jnp.mean(y, axis=0, keepdims=True)


def _attn_mlp_kernel(gap_ref, w1_ref, b1_ref, w2_ref, b2_ref, att_ref):
    """Split-attention MLP (radix=1): sigmoid(relu(gap@w1+b1) @ w2 + b2)."""
    g = gap_ref[...].astype(w1_ref.dtype)
    a = jnp.dot(g, w1_ref[...], preferred_element_type=jnp.float32) + b1_ref[...]
    a = jnp.maximum(a, 0.0).astype(w2_ref.dtype)
    logits = jnp.dot(a, w2_ref[...], preferred_element_type=jnp.float32) + b2_ref[...]
    att_ref[...] = jax.nn.sigmoid(logits)


def _tail_down_kernel(x2_ref, att_ref, w3_ref, b3_ref, xs_ref, wd_ref, bd_ref, o_ref):
    """o = relu( (att*x2) @ w3 + b3 + (xs @ wd + bd) )  (conv3+bn3+downsample+add+relu)."""
    xg = (x2_ref[0].astype(jnp.float32) * att_ref[0]).astype(w3_ref.dtype)
    y = jnp.dot(xg, w3_ref[...], preferred_element_type=jnp.float32) + b3_ref[...]
    r = jnp.dot(xs_ref[0], wd_ref[...], preferred_element_type=jnp.float32) + bd_ref[...]
    o_ref[0] = jnp.maximum(y + r, 0.0).astype(o_ref.dtype)


def _tail_ident_kernel(x2_ref, att_ref, w3_ref, b3_ref, res_ref, o_ref):
    """o = relu( (att*x2) @ w3 + b3 + residual )   (conv3+bn3+add+relu)."""
    xg = (x2_ref[0].astype(jnp.float32) * att_ref[0]).astype(w3_ref.dtype)
    y = jnp.dot(xg, w3_ref[...], preferred_element_type=jnp.float32) + b3_ref[...]
    y = y + res_ref[0].astype(jnp.float32)
    o_ref[0] = jnp.maximum(y, 0.0).astype(o_ref.dtype)


# ----------------------------------------------------------------------------
# Pallas wrappers
# ----------------------------------------------------------------------------
def matmul_bias_act(x, w, b, relu=True, tm_max=256):
    """Row-tiled (x @ w + b) [+relu].  Rows padded to a multiple of the tile."""
    M, K = x.shape
    N = w.shape[1]
    tm = min(tm_max, _round_up(M, 8))
    Mp = _round_up(M, tm)
    xpad = jnp.pad(x, ((0, Mp - M), (0, 0))) if Mp != M else x
    out = pl.pallas_call(
        functools.partial(_mm_bias_kernel, relu=relu),
        out_shape=jax.ShapeDtypeStruct((Mp, N), jnp.bfloat16),
        grid=(Mp // tm,),
        in_specs=[
            pl.BlockSpec((tm, K), lambda i: (i, 0)),
            pl.BlockSpec((K, N), lambda i: (0, 0)),
            pl.BlockSpec((1, N), lambda i: (0, 0)),
        ],
        out_specs=pl.BlockSpec((tm, N), lambda i: (i, 0)),
        compiler_params=_PAR1,
    )(xpad, w, b.reshape(1, N))
    return out[:M] if Mp != M else out


def splat_conv3x3(xps, w, b, *, batch, stride, Ho, Wo):
    """Fused 3x3 conv + bn0 + relu + GAP, one grid step per image."""
    ss = stride * stride
    _, Hq, Wq, C = xps.shape
    Cout = w.shape[-1]
    out, gap = pl.pallas_call(
        functools.partial(_conv3x3_gap_kernel, stride=stride, Ho=Ho, Wo=Wo),
        out_shape=(
            jax.ShapeDtypeStruct((batch, Ho * Wo, Cout), jnp.bfloat16),
            jax.ShapeDtypeStruct((batch, 1, Cout), jnp.float32),
        ),
        grid=(batch,),
        in_specs=[
            pl.BlockSpec((ss, Hq, Wq, C), lambda n: (n, 0, 0, 0)),
            pl.BlockSpec((9, C, Cout), lambda n: (0, 0, 0)),
            pl.BlockSpec((1, Cout), lambda n: (0, 0)),
        ],
        out_specs=(
            pl.BlockSpec((1, Ho * Wo, Cout), lambda n: (n, 0, 0)),
            pl.BlockSpec((1, 1, Cout), lambda n: (n, 0, 0)),
        ),
        compiler_params=_PAR1,
    )(xps, w, b.reshape(1, Cout))
    return out, gap.reshape(batch, Cout)


def attn_mlp(gap, w1, b1, w2, b2):
    """Batched split-attention MLP on the pooled (N, C) matrix."""
    N, C = gap.shape
    I = w1.shape[1]
    return pl.pallas_call(
        _attn_mlp_kernel,
        out_shape=jax.ShapeDtypeStruct((N, C), jnp.float32),
        grid=(1,),
        in_specs=[
            pl.BlockSpec((N, C), lambda i: (0, 0)),
            pl.BlockSpec((C, I), lambda i: (0, 0)),
            pl.BlockSpec((1, I), lambda i: (0, 0)),
            pl.BlockSpec((I, C), lambda i: (0, 0)),
            pl.BlockSpec((1, C), lambda i: (0, 0)),
        ],
        out_specs=pl.BlockSpec((N, C), lambda i: (0, 0)),
        compiler_params=_PAR1,
    )(gap, w1, b1.reshape(1, I), w2, b2.reshape(1, C))


def bottleneck_tail_down(x2, att, w3, b3, xs, wd, bd):
    N, HW, C = x2.shape
    C4 = w3.shape[1]
    Cin = xs.shape[-1]
    return pl.pallas_call(
        _tail_down_kernel,
        out_shape=jax.ShapeDtypeStruct((N, HW, C4), jnp.bfloat16),
        grid=(N,),
        in_specs=[
            pl.BlockSpec((1, HW, C), lambda n: (n, 0, 0)),
            pl.BlockSpec((1, 1, C), lambda n: (n, 0, 0)),
            pl.BlockSpec((C, C4), lambda n: (0, 0)),
            pl.BlockSpec((1, C4), lambda n: (0, 0)),
            pl.BlockSpec((1, HW, Cin), lambda n: (n, 0, 0)),
            pl.BlockSpec((Cin, C4), lambda n: (0, 0)),
            pl.BlockSpec((1, C4), lambda n: (0, 0)),
        ],
        out_specs=pl.BlockSpec((1, HW, C4), lambda n: (n, 0, 0)),
        compiler_params=_PAR1,
    )(x2, att.reshape(N, 1, C), w3, b3.reshape(1, C4), xs, wd, bd.reshape(1, C4))


def bottleneck_tail_ident(x2, att, w3, b3, res):
    N, HW, C = x2.shape
    C4 = w3.shape[1]
    return pl.pallas_call(
        _tail_ident_kernel,
        out_shape=jax.ShapeDtypeStruct((N, HW, C4), jnp.bfloat16),
        grid=(N,),
        in_specs=[
            pl.BlockSpec((1, HW, C), lambda n: (n, 0, 0)),
            pl.BlockSpec((1, 1, C), lambda n: (n, 0, 0)),
            pl.BlockSpec((C, C4), lambda n: (0, 0)),
            pl.BlockSpec((1, C4), lambda n: (0, 0)),
            pl.BlockSpec((1, HW, C4), lambda n: (n, 0, 0)),
        ],
        out_specs=pl.BlockSpec((1, HW, C4), lambda n: (n, 0, 0)),
        compiler_params=_PAR1,
    )(x2, att.reshape(N, 1, C), w3, b3.reshape(1, C4), res)


# ----------------------------------------------------------------------------
# JAX glue: pad + stride-phase split so every 3x3 tap is a contiguous slice
# inside the kernel (replaces the old 9x HBM im2col with a 1x copy).
# ----------------------------------------------------------------------------
def phase_split_3x3(x, stride):
    N, H, W, C = x.shape
    Ho = (H - 1) // stride + 1          # pad=1, kernel=3
    Wo = (W - 1) // stride + 1
    Hq = Ho + 2 // stride
    Wq = Wo + 2 // stride
    xp = jnp.pad(x, ((0, 0), (1, 1), (1, 1), (0, 0)))
    rows = []
    for ph in range(stride):
        cols = []
        for pw in range(stride):
            sl = xp[:, ph::stride, pw::stride, :][:, :Hq, :Wq, :]
            pad_h, pad_w = Hq - sl.shape[1], Wq - sl.shape[2]
            if pad_h or pad_w:
                sl = jnp.pad(sl, ((0, 0), (0, pad_h), (0, pad_w), (0, 0)))
            cols.append(sl)
        rows.append(jnp.stack(cols, axis=1))
    xps = jnp.stack(rows, axis=1)                       # (N, s, s, Hq, Wq, C)
    return xps.reshape(N * stride * stride, Hq, Wq, C), (Ho, Wo)


# ----------------------------------------------------------------------------
# Parameter construction (deterministic, mirrors PyTorch shapes/init; eval-mode
# BN folded into weights, channels lane-padded to multiples of 128).
# ----------------------------------------------------------------------------
def _bn_scale_shift(c):
    # eval-mode BN right after init: gamma=1, beta=0, mean=0, var=1
    scale = jnp.full((c,), 1.0 / math.sqrt(1.0 + _BN_EPS), jnp.float32)
    shift = jnp.zeros((c,), jnp.float32)
    return scale, shift


def _kaiming(key, kh, kw, cin, cout):
    std = math.sqrt(2.0 / (cout * kh * kw))
    return jax.random.normal(key, (kh, kw, cin, cout), jnp.float32) * std


def _pad2(w, rows, cols):
    return jnp.pad(w, ((0, rows - w.shape[0]), (0, cols - w.shape[1])))


def _pad1(v, n):
    return jnp.pad(v, (0, n - v.shape[0]))


def make_block_params(key, inplanes, planes, stride, has_downsample):
    gw = planes                              # int(planes*64/64)*cardinality(1)
    inter = max(gw // 4, 32)                 # SplAtConv2d inter_channels
    gwp = _round_up(gw, 128)                 # lane padding (zero, inert)
    interp = _round_up(inter, 128)
    c4 = planes * 4
    keys = jax.random.split(key, 6)
    p = {"stride": stride}

    # conv1 (1x1) + bn1  -> folded
    w = _kaiming(keys[0], 1, 1, inplanes, gw).reshape(inplanes, gw)
    s, sh = _bn_scale_shift(gw)
    p["conv1_w"] = _pad2(w * s[None, :], inplanes, gwp).astype(jnp.bfloat16)
    p["b1"] = _pad1(sh, gwp)

    # SplAtConv2d 3x3 conv + bn0 -> folded, per-tap layout (9, Cin, Cout)
    w = _kaiming(keys[1], 3, 3, gw, gw)
    s, sh = _bn_scale_shift(gw)
    w = w * s[None, None, None, :]
    w = jnp.pad(w, ((0, 0), (0, 0), (0, gwp - gw), (0, gwp - gw)))
    p["conv2_w"] = w.reshape(9, gwp, gwp).astype(jnp.bfloat16)
    p["b0"] = _pad1(sh, gwp)

    # attention MLP: fc1 + bn1s (+relu), fc2 (+sigmoid in kernel)
    w = _kaiming(keys[2], 1, 1, gw, inter).reshape(gw, inter)
    s, sh = _bn_scale_shift(inter)
    p["fc1_w"] = _pad2(w * s[None, :], gwp, interp).astype(jnp.bfloat16)
    p["fc1_b"] = _pad1(jnp.zeros((inter,), jnp.float32) * s + sh, interp)
    w = _kaiming(keys[3], 1, 1, inter, gw).reshape(inter, gw)
    p["fc2_w"] = _pad2(w, interp, gwp).astype(jnp.bfloat16)
    p["fc2_b"] = jnp.zeros((gwp,), jnp.float32)

    # conv3 (1x1) + bn3 -> folded
    w = _kaiming(keys[4], 1, 1, gw, c4).reshape(gw, c4)
    s, sh = _bn_scale_shift(c4)
    p["conv3_w"] = _pad2(w * s[None, :], gwp, c4).astype(jnp.bfloat16)
    p["b3"] = sh

    if has_downsample:
        w = _kaiming(keys[5], 1, 1, inplanes, c4).reshape(inplanes, c4)
        s, sh = _bn_scale_shift(c4)
        p["down_w"] = (w * s[None, :]).astype(jnp.bfloat16)
        p["bd"] = sh
    return p


def make_params(key, layers=(1, 1, 1, 1)):
    planes_list = [32, 64, 128, 256]
    strides = [1, 2, 2, 2]
    inplanes = 64                     # deep_stem=False
    expansion = 4
    params = []
    keys = jax.random.split(key, sum(layers))
    ki = 0
    for planes, stride, nblocks in zip(planes_list, strides, layers):
        layer = []
        for b in range(nblocks):
            s = stride if b == 0 else 1
            has_down = (b == 0) and (s != 1 or inplanes != planes * expansion)
            layer.append(make_block_params(keys[ki], inplanes, planes, s, has_down))
            ki += 1
            inplanes = planes * expansion
        params.append(layer)
    return params


# ----------------------------------------------------------------------------
# Forward pass (mirrors ResNeSt Bottleneck with radix=1, eval mode)
# ----------------------------------------------------------------------------
def block_forward(x, p):
    N, H, W, Cin = x.shape
    stride = p["stride"]
    gwp = p["conv1_w"].shape[1]
    c4 = p["conv3_w"].shape[1]

    # conv1 (1x1) + bn1 + relu
    t = matmul_bias_act(x.reshape(N * H * W, Cin), p["conv1_w"], p["b1"], relu=True)
    t = t.reshape(N, H, W, gwp)

    # SplAtConv2d: 3x3 conv (stride, pad=1) + bn0 + relu, fused GAP output
    xps, (Ho, Wo) = phase_split_3x3(t, stride)
    out2, gap = splat_conv3x3(xps, p["conv2_w"], p["b0"],
                              batch=N, stride=stride, Ho=Ho, Wo=Wo)

    # split-attention gate (radix=1 -> sigmoid), batched on pooled features
    att = attn_mlp(gap, p["fc1_w"], p["fc1_b"], p["fc2_w"], p["fc2_b"])

    # gate * conv3 + bn3 + residual (downsample fused) + relu
    if "down_w" in p:
        xs = x[:, ::stride, ::stride, :].reshape(N, Ho * Wo, Cin)
        out = bottleneck_tail_down(out2, att, p["conv3_w"], p["b3"],
                                   xs, p["down_w"], p["bd"])
    else:
        res = x.reshape(N, Ho * Wo, Cin)          # Cin == c4 here
        out = bottleneck_tail_ident(out2, att, p["conv3_w"], p["b3"], res)
    return out.reshape(N, Ho, Wo, c4)


def resnest_forward(x_nchw, params):
    x = jnp.transpose(x_nchw, (0, 2, 3, 1)).astype(jnp.bfloat16)   # NCHW -> NHWC
    for layer in params:                                           # layer1..layer4
        for bp in layer:
            x = block_forward(x, bp)
    return jnp.transpose(x, (0, 3, 1, 2)).astype(jnp.float32)      # NHWC -> NCHW


# ----------------------------------------------------------------------------
if __name__ == "__main__":
    key = jax.random.PRNGKey(0)
    kx, kp = jax.random.split(key)

    # forward() takes the output of the (absent) stem, so channels = inplanes = 64
    x = jax.random.normal(kx, (2, 64, 16, 16), jnp.float32)     # NCHW, like PyTorch
    params = make_params(kp, layers=(1, 1, 1, 1))

    out = resnest_forward(x, params)
    out = jax.block_until_ready(out)

    assert out.shape == (2, 1024, 2, 2), out.shape
    assert out.dtype == jnp.float32
    assert bool(jnp.all(jnp.isfinite(out)))
    print("KERNEL_OK")
</pallas_src>

<mosaic_0001>
module attributes {stable_mosaic.version = 11 : i64} {
  func.func @_mm_bias_kernel(%arg0: i32, %arg1: memref<256x64xbf16, #tpu.memory_space<vmem>>, %arg2: memref<64x128xbf16, #tpu.memory_space<vmem>>, %arg3: memref<1x128xf32, #tpu.memory_space<vmem>>, %arg4: memref<256x128xbf16, #tpu.memory_space<vmem>>) attributes {dimension_semantics = [#tpu.dimension_semantics<parallel>], iteration_bounds = array<i64: 2>, scalar_prefetch = 0 : i64, scratch_operands = 0 : i64, tpu.core_type = #tpu.core_type<tc>, window_params = [{transform_indices = @transform_0, window_bounds = array<i64: 256, 64>}, {pipeline_mode = #tpu.pipeline_mode<synchronous>, transform_indices = @transform_1, window_bounds = array<i64: 64, 128>}, {pipeline_mode = #tpu.pipeline_mode<synchronous>, transform_indices = @transform_2, window_bounds = array<i64: 1, 128>}, {transform_indices = @transform_3, window_bounds = array<i64: 256, 128>}]} {
    %c0 = arith.constant 0 : index
    %c0_0 = arith.constant 0 : index
    %0 = vector.load %arg1[%c0, %c0_0] : memref<256x64xbf16, #tpu.memory_space<vmem>>, vector<256x64xbf16>
    %c0_1 = arith.constant 0 : index
    %c0_2 = arith.constant 0 : index
    %1 = vector.load %arg2[%c0_1, %c0_2] : memref<64x128xbf16, #tpu.memory_space<vmem>>, vector<64x128xbf16>
    %cst = arith.constant dense<0.000000e+00> : vector<256x128xf32>
    %2 = tpu.matmul %0, %1, %cst {dimension_numbers = #tpu.dot_dimension_numbers<[1], [0], [0], [1], [0, 0, 1, 1], [], []>} : vector<256x64xbf16>, vector<64x128xbf16>, vector<256x128xf32> -> vector<256x128xf32>
    %c0_3 = arith.constant 0 : index
    %c0_4 = arith.constant 0 : index
    %3 = vector.load %arg3[%c0_3, %c0_4] : memref<1x128xf32, #tpu.memory_space<vmem>>, vector<1x128xf32>
    %4 = vector.broadcast %3 : vector<1x128xf32> to vector<256x128xf32>
    %5 = arith.addf %2, %4 : vector<256x128xf32>
    %cst_5 = arith.constant 0.000000e+00 : f32
    %6 = vector.broadcast %cst_5 : f32 to vector<256x128xf32>
    %7 = arith.maximumf %5, %6 : vector<256x128xf32>
    %8 = arith.truncf %7 : vector<256x128xf32> to vector<256x128xbf16>
    %c0_6 = arith.constant 0 : index
    %c0_7 = arith.constant 0 : index
    %9 = vector.load %arg4[%c0_6, %c0_7] : memref<256x128xbf16, #tpu.memory_space<vmem>>, vector<256x128xbf16>
    tpu.vector_store %arg4[%c0_6, %c0_7], %8 {strides = array<i32>} : memref<256x128xbf16, #tpu.memory_space<vmem>>, vector<256x128xbf16>,
    return
  }
  func.func @transform_0(%arg0: i32) -> (i32, i32) {
    %c0_i32 = arith.constant 0 : i32
    %c0_i32_0 = arith.constant 0 : i32
    return %arg0, %c0_i32 : i32, i32
  }
  func.func @transform_1(%arg0: i32) -> (i32, i32) {
    %c0_i32 = arith.constant 0 : i32
    %c0_i32_0 = arith.constant 0 : i32
    %c0_i32_1 = arith.constant 0 : i32
    return %c0_i32, %c0_i32_0 : i32, i32
  }
  func.func @transform_2(%arg0: i32) -> (i32, i32) {
    %c0_i32 = arith.constant 0 : i32
    %c0_i32_0 = arith.constant 0 : i32
    %c0_i32_1 = arith.constant 0 : i32
    return %c0_i32, %c0_i32_0 : i32, i32
  }
  func.func @transform_3(%arg0: i32) -> (i32, i32) {
    %c0_i32 = arith.constant 0 : i32
    %c0_i32_0 = arith.constant 0 : i32
    return %arg0, %c0_i32 : i32, i32
  }
}

</mosaic_0001>

<bundles_post_ra>
// kernel: tpu_custom_call.1
= control target key start
LH: loop header
LB: loop body
LE: loop exit
PB: predicated region body
PF: predicated region fallthrough
CT: control target
= control target key end

     0   :  { %8 = vsyncpa [#allocation3], 0  ;;  %s1432_s0 = inlined_call_operand.vmem [shape: bf16[512,64], index: 0, kind: input, shape index: {}]   ;;  %s1433_s1 = inlined_call_operand.vmem [shape: bf16[64,128], index: 1, kind: input, shape index: {}]   ;;  %s1434_s2 = inlined_call_operand.vmem [shape: f32[1,128], index: 2, kind: input, shape index: {}]   ;;  %s1435_s3 = inlined_call_operand.hbm [shape: bf16[512,128], index: 3, kind: output, shape index: {}]  }
   0x1   :  { %10 = vsyncpa [#allocation3 + $0x1], 0  ;;  %s1225_s12 = smov 0   ;;  %s1227_s13 = smov 0  }
   0x2   :  { %s1229_s14 = smov 0   ;;  %s1231_s15 = smov 0  }
   0x3 LB: > { %s1246_s16 = sadd.s32 4294967295, %s1200_s15   ;;  %s802_s17 = sadd.s32 4294967294, %s1200_s15   ;;  %s1200_s15 = sphi %s1231_s15, %s1441_s15   ;;  %s1196_s14 = sphi %s1229_s14, %s1440_s14   ;;  %s1192_s13 = sphi %s1227_s13, %s1439_s13   ;;  %s1188_s12 = sphi %s1225_s12, %s1438_s12  }
   0x4   : > { %s1250_s18 = sadd.s32 1, %s1200_s15   ;;  %s91_s19 = sadd.s32 1, %s1196_s14 }
   0x5   : > { %s88_s20 = ssub.s32 %s1200_s15, %s1250_s18  ;;  %p101_p0 = scmp.ne.s32.totalorder %s1196_s14, %s1192_s13 }
   0x6   : > { %p89_p1 = scmp.eq.s32.totalorder %s88_s20, 0  ;;  %p102_p2 = scmp.eq.s32.totalorder %s1246_s16, 1 }
   0x7   : > { %p107_p3 = scmp.ne.s32.totalorder %s1192_s13, %s1188_s12  ;;  %p108_p4 = scmp.eq.s32.totalorder %s802_s17, 1 }
   0x8   : > { %s1261_s21 = scalar_select %p89_p1, %s1196_s14, %s91_s19  }
   0x9   : > { %p1263_p5 = por %p102_p2, %p101_p0  ;;  %p1267_p6 = por %p108_p4, %p107_p3 }
   0xa   : > { %p805_p7 = scmp.ge.s32.totalorder %s1200_s15, 1  ;;  %p141_p8 = scmp.lt.s32.totalorder %s1200_s15, 3 }
   0xc   : > { %p142_p9 = pnand %p805_p7, %p141_p8 }
   0xd   : > { %s807_s26 = sshll.u32 (!%p142_p9), %s1246_s16, 5  ;;  %s162_s17 = sand.u32 (!%p142_p9), 1, %s1192_s13  }
   0xe   : > { %145 = sbr.rel (%p142_p9) target bundleno = 279 (0x117), region = 32  ;;  %p166_p10 = scmp.lt.s32.totalorder (!%p142_p9), %s807_s26, 63 }
   0xf   : > { %s806_s19 = sshll.u32 (!%p142_p9), %s162_s17, 7  ;;  %s915_s24 = sshll.u32 (!%p142_p9), %s1246_s16, 11 }
  0x10   : > { %s1341_s20 = scalar_lea.vmem (!%p142_p9), [#allocation2], %s806_s19  ;;  %s1382_s28 = scalar_lea.hbm (!%p142_p9), %s1435_s3, %s915_s24 }
  0x11   : > { %s740_s25 = sshll.u32 (!%p142_p9), %s1341_s20, 4  ;;  %s1392_s16 = scalar_lea.sflag (!%p142_p9), [#allocation3], %s162_s17  ;;  %s1384_s25 = int_to_ptr.vmem [resolvable:$true] %s740_s25 }
  0x12   : > { %s1140_s29 = scalar_lea.vmem (!%p142_p9), %s1384_s25, 2048  ;;  %s1202_s30 = smov (!%p142_p9), [#allocation2]  }
  0x13   : > { %v1120_v0 = vld [vmem:[%s1433_s1 + $0x18] sm:$0xff]   ;;  %v1121_v1 = vld [vmem:[%s1433_s1 + $0x10] sm:$0xff]   ;;  %s1443_s26 = smov (!%p166_p10, %s807_s26), 63  ;;  %v1122_v2 = vld [vmem:[%s1433_s1 + $0x8] sm:$0xff]   ;;  %vm324_vm0 = vcmask 523264   ;;  %p1141_p11 = scmp.ne.s32.totalorder %s1384_s25, %s1140_s29 }
  0x14   : > { %1031 = vmatprep.subr.bf16.mxu0 %v1120_v0  ;;  %1071 = vmatprep.subr.bf16.mxu1 %v1120_v0  ;;  %s808_s4 = sshll.u32 %s1443_s26, 2  ;;  %v1123_v3 = vld [vmem:[%s1433_s1] sm:$0xff]  }
  0x15   : > { %1032 = vmatpush3.bf16.msra.mxu0 %v1120_v0  ;;  %1075 = vmatpush3.bf16.msra.mxu1 %v1120_v0  ;;  %s1289_s9 = scalar_lea.vmem %s1432_s0, %s808_s4  ;;  %v1326_v20 = vld [vmem:[%s1434_s2] ss:$0 sm:$0xff]  ;;  %p1142_p12 = pnand %p1141_p11, %p1263_p5 }
  0x16   : > { %1033 = vmatprep.subr.bf16.mxu0 %v1121_v1  ;;  %1072 = vmatprep.subr.bf16.mxu1 %v1121_v1  ;;  %v1124_v4 = vld [vmem:[%s1289_s9] sm:$0xff]   ;;  %v1126_v6 = vld [vmem:[%s1289_s9 + $0x8] sm:$0xff]   ;;  %v1128_v8 = vld [vmem:[%s1289_s9 + $0x10] sm:$0xff]   ;;  %s1144_s4 = sshll.u32 %s1202_s30, 4  ;;  %s1145_s4 = int_to_ptr.vmem [resolvable:$false] %s1144_s4 }
  0x17   : > { %v1125_v5 = vld [vmem:[%s1289_s9 + $0x40] sm:$0xff]   ;;  %1039 = vmatprep.mubr.msk.bf16.mxu0 %vm324_vm0, %v1124_v4  ;;  %v1127_v7 = vld [vmem:[%s1289_s9 + $0x48] sm:$0xff]   ;;  %v1129_v9 = vld [vmem:[%s1289_s9 + $0x50] sm:$0xff]   ;;  %p1143_p13 = pneg %p1142_p12  ;;  %s1146_s5 = scalar_lea.vmem %s1145_s4, 4096 }
  0x18   : > { %1055 = vmatprep.mubr.msk.bf16.mxu1 %vm324_vm0, %v1125_v5  ;;  %v1130_v10 = vld [vmem:[%s1289_s9 + $0x18] sm:$0xff]   ;;  %v1132_v12 = vld [vmem:[%s1289_s9 + $0x20] sm:$0xff]   ;;  %v1134_v14 = vld [vmem:[%s1289_s9 + $0x28] sm:$0xff]   ;;  %p1147_p0 = scmp.lt.s32.totalorder %s1384_s25, %s1145_s4  ;;  %p1148_p1 = scmp.lt.s32.totalorder %s1146_s5, %s1140_s29 }
  0x19   : > { %1034 = vmatpush3.bf16.msra.mxu0 %v1121_v1  ;;  %1076 = vmatpush3.bf16.msra.mxu1 %v1121_v1  ;;  %v1131_v11 = vld [vmem:[%s1289_s9 + $0x58] sm:$0xff]   ;;  %v1133_v13 = vld [vmem:[%s1289_s9 + $0x60] sm:$0xff]   ;;  %v1135_v15 = vld [vmem:[%s1289_s9 + $0x68] sm:$0xff]  }
  0x1a   : > { %1035 = vmatprep.subr.bf16.mxu0 %v1122_v2  ;;  %1073 = vmatprep.subr.bf16.mxu1 %v1122_v2  ;;  %v1136_v16 = vld [vmem:[%s1289_s9 + $0x30] sm:$0xff]   ;;  %v1138_v18 = vld [vmem:[%s1289_s9 + $0x38] sm:$0xff]   ;;  %p1149_p2 = por %p1148_p1, %p1147_p0 }
  0x1b   : > { %v1137_v17 = vld [vmem:[%s1289_s9 + $0x70] sm:$0xff]   ;;  %v1139_v19 = vld [vmem:[%s1289_s9 + $0x78] sm:$0xff]  }
  0x1c   : > { %p1150_p3 = pnand %p1149_p2, %p1143_p13 }
  0x1d   : > { %1036 = vmatpush3.bf16.msra.mxu0 %v1122_v2  ;;  %1077 = vmatpush3.bf16.msra.mxu1 %v1122_v2 }
  0x1e   : > { %1037 = vmatprep.subr.bf16.mxu0 %v1123_v3  ;;  %1074 = vmatprep.subr.bf16.mxu1 %v1123_v3 }
  0x21   : > { %1038 = vmatpush3.bf16.msra.mxu0 %v1123_v3  ;;  %1078 = vmatpush3.bf16.msra.mxu1 %v1123_v3 }
  0x24   : > { %1040 = vmatmul.mubr.msk.bf16.vlgmr.msra.gmra.mxu0 %vm324_vm0, %v1126_v6  ;;  %1056 = vmatmul.mubr.msk.bf16.vlgmr.msra.gmra.mxu1 %vm324_vm0, %v1127_v7 }
  0x25   : > { %1043 = vmatprep.mubr.msk.bf16.mxu0 %vm324_vm0, %v1128_v8  ;;  %1059 = vmatprep.mubr.msk.bf16.mxu1 %vm324_vm0, %v1129_v9 }
  0x2c   : > { %1044 = vmatmul.mubr.msk.bf16.gmra.mxu0 %vm324_vm0, %v1130_v10  ;;  %1060 = vmatmul.mubr.msk.bf16.gmra.mxu1 %vm324_vm0, %v1131_v11 }
  0x2d   : > { %1047 = vmatprep.mubr.msk.bf16.mxu0 %vm324_vm0, %v1132_v12  ;;  %1063 = vmatprep.mubr.msk.bf16.mxu1 %vm324_vm0, %v1133_v13 }
  0x34   : > { %1048 = vmatmul.mubr.msk.bf16.gmra.mxu0 %vm324_vm0, %v1134_v14  ;;  %1064 = vmatmul.mubr.msk.bf16.gmra.mxu1 %vm324_vm0, %v1135_v15 }
  0x35   : > { %1051 = vmatprep.mubr.msk.bf16.mxu0 %vm324_vm0, %v1136_v16  ;;  %1067 = vmatprep.mubr.msk.bf16.mxu1 %vm324_vm0, %v1137_v17 }
  0x3c   : > { %1052 = vmatmul.mubr.msk.bf16.gmra.mxu0 %vm324_vm0, %v1138_v18  ;;  %1068 = vmatmul.mubr.msk.bf16.gmra.mxu1 %vm324_vm0, %v1139_v19 }
  0xe4   : > { %v1041_v21 = vpop.f32.mrf.mxu0  ;;  %v1057_v22 = vpop.f32.mrf.mxu1 }
  0xe5   : > { %v416_v23 = vadd.f32 %v1041_v21, %v1326_v20  ;;  %v480_v24 = vadd.f32 %v1057_v22, %v1326_v20 }
  0xe6   : > { %v407_v25 = vpop.f32.mrf.mxu0  ;;  %v471_v26 = vpop.f32.mrf.mxu1 }
  0xe7   : > { %v408_v27 = vadd.f32 %v1326_v20, %v407_v25  ;;  %v472_v28 = vadd.f32 %v1326_v20, %v471_v26  ;;  %v536_v33 = vmax.f32 %v416_v23, 0.0  ;;  %v552_v34 = vmax.f32 %v480_v24, 0.0 }
  0xe8   : > { %v1042_v29 = vpop.f32.mrf.mxu0  ;;  %v1058_v30 = vpop.f32.mrf.mxu1 }
  0xe9   : > { %v419_v31 = vadd.f32 %v1042_v29, %v1326_v20  ;;  %v483_v32 = vadd.f32 %v1058_v30, %v1326_v20  ;;  %v534_v41 = vmax.f32 %v408_v27, 0.0  ;;  %v550_v42 = vmax.f32 %v472_v28, 0.0 }
  0xea   : > { %v410_v35 = vpop.f32.mrf.mxu0  ;;  %v474_v36 = vpop.f32.mrf.mxu1 }
  0xeb   : > { %v537_v37 = vmax.f32 %v419_v31, 0.0  ;;  %v553_v38 = vmax.f32 %v483_v32, 0.0  ;;  %v411_v39 = vadd.f32 %v1326_v20, %v410_v35  ;;  %v475_v40 = vadd.f32 %v1326_v20, %v474_v36 }
  0xec   : > { %v1045_v43 = vpop.f32.mrf.mxu0  ;;  %v1061_v44 = vpop.f32.mrf.mxu1 }
  0xed   : > { %v924_v45 = vpack.c.bf16 %v537_v37, %v536_v33  ;;  %v964_v46 = vpack.c.bf16 %v553_v38, %v552_v34  ;;  %v535_v47 = vmax.f32 %v411_v39, 0.0  ;;  %v551_v48 = vmax.f32 %v475_v40, 0.0 }
  0xee   : > { %v432_v49 = vadd.f32 %v1045_v43, %v1326_v20  ;;  %v496_v50 = vadd.f32 %v1061_v44, %v1326_v20  ;;  %v423_v51 = vpop.f32.mrf.mxu0  ;;  %v487_v52 = vpop.f32.mrf.mxu1 }
  0xef   : > { %996 = vst [vmem:[%s1341_s20 + $0x8] sm:$0xff] %v924_v45   ;;  %1004 = vst [vmem:[%s1341_s20 + $0x48] sm:$0xff] %v964_v46   ;;  %v919_v53 = vpack.c.bf16 %v535_v47, %v534_v41  ;;  %v959_v54 = vpack.c.bf16 %v551_v48, %v550_v42  ;;  %v424_v55 = vadd.f32 %v1326_v20, %v423_v51 }
  0xf0   : > { %v488_v56 = vadd.f32 %v1326_v20, %v487_v52  ;;  %v1046_v57 = vpop.f32.mrf.mxu0  ;;  %v1062_v58 = vpop.f32.mrf.mxu1  ;;  %v540_v61 = vmax.f32 %v432_v49, 0.0  ;;  %v556_v62 = vmax.f32 %v496_v50, 0.0 }
  0xf1   : > { %920 = vst [vmem:[%s1341_s20] sm:$0xff] %v919_v53   ;;  %1003 = vst [vmem:[%s1341_s20 + $0x40] sm:$0xff] %v959_v54   ;;  %v435_v59 = vadd.f32 %v1046_v57, %v1326_v20  ;;  %v499_v60 = vadd.f32 %v1062_v58, %v1326_v20  ;;  %v538_v5 = vmax.f32 %v424_v55, 0.0 }
  0xf2   : > { %v426_v63 = vpop.f32.mrf.mxu0  ;;  %v490_v0 = vpop.f32.mrf.mxu1  ;;  %v554_v6 = vmax.f32 %v488_v56, 0.0 }
  0xf3   : > { %v541_v1 = vmax.f32 %v435_v59, 0.0  ;;  %v557_v2 = vmax.f32 %v499_v60, 0.0  ;;  %v427_v3 = vadd.f32 %v1326_v20, %v426_v63  ;;  %v491_v4 = vadd.f32 %v1326_v20, %v490_v0 }
  0xf4   : > { %v1049_v7 = vpop.f32.mrf.mxu0  ;;  %v1065_v8 = vpop.f32.mrf.mxu1 }
  0xf5   : > { %v934_v9 = vpack.c.bf16 %v541_v1, %v540_v61  ;;  %v974_v10 = vpack.c.bf16 %v557_v2, %v556_v62  ;;  %v539_v11 = vmax.f32 %v427_v3, 0.0  ;;  %v555_v12 = vmax.f32 %v491_v4, 0.0 }
  0xf6   : > { %v448_v13 = vadd.f32 %v1049_v7, %v1326_v20  ;;  %v512_v14 = vadd.f32 %v1065_v8, %v1326_v20  ;;  %v439_v15 = vpop.f32.mrf.mxu0  ;;  %v503_v16 = vpop.f32.mrf.mxu1 }
  0xf7   : > { %998 = vst [vmem:[%s1341_s20 + $0x18] sm:$0xff] %v934_v9   ;;  %1006 = vst [vmem:[%s1341_s20 + $0x58] sm:$0xff] %v974_v10   ;;  %v929_v17 = vpack.c.bf16 %v539_v11, %v538_v5  ;;  %v969_v18 = vpack.c.bf16 %v555_v12, %v554_v6  ;;  %v440_v19 = vadd.f32 %v1326_v20, %v439_v15 }
  0xf8   : > { %v504_v21 = vadd.f32 %v1326_v20, %v503_v16  ;;  %v1050_v22 = vpop.f32.mrf.mxu0  ;;  %v1066_v23 = vpop.f32.mrf.mxu1  ;;  %v544_v26 = vmax.f32 %v448_v13, 0.0  ;;  %v560_v27 = vmax.f32 %v512_v14, 0.0 }
  0xf9   : > { %997 = vst [vmem:[%s1341_s20 + $0x10] sm:$0xff] %v929_v17   ;;  %1005 = vst [vmem:[%s1341_s20 + $0x50] sm:$0xff] %v969_v18   ;;  %v451_v24 = vadd.f32 %v1050_v22, %v1326_v20  ;;  %v515_v25 = vadd.f32 %v1066_v23, %v1326_v20  ;;  %v542_v34 = vmax.f32 %v440_v19, 0.0 }
  0xfa   : > { %v442_v28 = vpop.f32.mrf.mxu0  ;;  %v506_v29 = vpop.f32.mrf.mxu1  ;;  %v558_v35 = vmax.f32 %v504_v21, 0.0 }
  0xfb   : > { %v545_v30 = vmax.f32 %v451_v24, 0.0  ;;  %v561_v31 = vmax.f32 %v515_v25, 0.0  ;;  %v443_v32 = vadd.f32 %v1326_v20, %v442_v28  ;;  %v507_v33 = vadd.f32 %v1326_v20, %v506_v29 }
  0xfc   : > { %v1053_v36 = vpop.f32.mrf.mxu0  ;;  %v1069_v37 = vpop.f32.mrf.mxu1 }
  0xfd   : > { %v944_v38 = vpack.c.bf16 %v545_v30, %v544_v26  ;;  %v984_v39 = vpack.c.bf16 %v561_v31, %v560_v27  ;;  %v543_v40 = vmax.f32 %v443_v32, 0.0  ;;  %v559_v41 = vmax.f32 %v507_v33, 0.0 }
  0xfe   : > { %v464_v42 = vadd.f32 %v1053_v36, %v1326_v20  ;;  %v528_v43 = vadd.f32 %v1069_v37, %v1326_v20  ;;  %v455_v44 = vpop.f32.mrf.mxu0  ;;  %v519_v45 = vpop.f32.mrf.mxu1 }
  0xff   : > { %1000 = vst [vmem:[%s1341_s20 + $0x28] sm:$0xff] %v944_v38   ;;  %1008 = vst [vmem:[%s1341_s20 + $0x68] sm:$0xff] %v984_v39   ;;  %v939_v46 = vpack.c.bf16 %v543_v40, %v542_v34  ;;  %v979_v47 = vpack.c.bf16 %v559_v41, %v558_v35  ;;  %v456_v48 = vadd.f32 %v1326_v20, %v455_v44 }
 0x100   : > { %v520_v49 = vadd.f32 %v1326_v20, %v519_v45  ;;  %v1054_v50 = vpop.f32.mrf.mxu0  ;;  %v1070_v51 = vpop.f32.mrf.mxu1  ;;  %v548_v54 = vmax.f32 %v464_v42, 0.0  ;;  %v564_v55 = vmax.f32 %v528_v43, 0.0 }
 0x101   : > { %999 = vst [vmem:[%s1341_s20 + $0x20] sm:$0xff] %v939_v46   ;;  %1007 = vst [vmem:[%s1341_s20 + $0x60] sm:$0xff] %v979_v47   ;;  %v467_v52 = vadd.f32 %v1054_v50, %v1326_v20  ;;  %v531_v53 = vadd.f32 %v1070_v51, %v1326_v20  ;;  %v546_v62 = vmax.f32 %v456_v48, 0.0 }
 0x102   : > { %v458_v56 = vpop.f32.mrf.mxu0  ;;  %v522_v57 = vpop.f32.mrf.mxu1  ;;  %v562_v63 = vmax.f32 %v520_v49, 0.0 }
 0x103   : > { %v549_v58 = vmax.f32 %v467_v52, 0.0  ;;  %v565_v59 = vmax.f32 %v531_v53, 0.0  ;;  %v459_v60 = vadd.f32 %v1326_v20, %v458_v56  ;;  %v523_v61 = vadd.f32 %v1326_v20, %v522_v57 }
 0x105   : > { %v954_v0 = vpack.c.bf16 %v549_v58, %v548_v54  ;;  %v994_v1 = vpack.c.bf16 %v565_v59, %v564_v55  ;;  %v547_v2 = vmax.f32 %v459_v60, 0.0  ;;  %v563_v3 = vmax.f32 %v523_v61, 0.0 }
 0x107   : > { %1002 = vst [vmem:[%s1341_s20 + $0x38] sm:$0xff] %v954_v0   ;;  %1010 = vst [vmem:[%s1341_s20 + $0x78] sm:$0xff] %v994_v1   ;;  %v949_v20 = vpack.c.bf16 %v547_v2, %v546_v62  ;;  %v989_v4 = vpack.c.bf16 %v563_v3, %v562_v63 }
 0x109   : > { %1001 = vst [vmem:[%s1341_s20 + $0x30] sm:$0xff] %v949_v20   ;;  %1009 = vst [vmem:[%s1341_s20 + $0x70] sm:$0xff] %v989_v4  }
 0x10a   : > { %1153 = shalt.err (!%p1150_p3)
}
 0x10b   : > { %s1154_s6 = scalar_lea.hbm %s1382_s28, 2048  ;;  %s1158_s9 = scalar_lea.hbm %s1435_s3, 4096 }
 0x10c   : > { %p1155_p4 = scmp.ne.s32.totalorder %s1382_s28, %s1154_s6  ;;  %p1159_p9 = scmp.lt.s32.totalorder %s1382_s28, %s1435_s3 }
 0x10d   : > { %p1160_p10 = scmp.lt.s32.totalorder %s1158_s9, %s1154_s6 }
 0x10e   : > { %p1156_p7 = pnand %p1155_p4, %p1263_p5 }
 0x10f   : > { %p1161_p11 = por %p1160_p10, %p1159_p9 }
 0x110   : > { %p1157_p8 = pneg %p1156_p7 }
 0x112   : > { %p1162_p12 = pnand %p1161_p11, %p1157_p8 }
 0x114   : > { %1165 = shalt.err (!%p1162_p12)
}
 0x115   : > { %s1203_s17 = smov 64   ;;  %s1204_s19 = smov 4  }
 0x116   : > { %1079 = dma.vmem_to_hbm [thread:$0]  (%p1263_p5), %s1384_s25, 2048, %s1382_s28, %s1392_s16, %s1203_s17, %s1203_s17, %s1204_s19  }
 0x117 PF: > { %p1085_p13 = scmp.ge.s32.totalorder %s1200_s15, 2  ;;  %s755_s20 = sand.u32 1, %s1188_s12  }
 0x118   : > { %s756_s24 = scalar_lea.sflag [#allocation3], %s755_s20 }
 0x119   : > { %p1082_p0 = pnand %p1085_p13, %p1267_p6 }
 0x11b   : > { %p1083_p1 = pneg %p1082_p0 }
 0x11d   : > { %1183 = dma.done.wait (%p1083_p1), %s756_s24, 2048  }
 0x11e   : > { %1185 = vsyncadd (%p1083_p1), %s756_s24, 4294965248  ;;  %p13_p2 = scmp.ge.s32.totalorder %s1250_s18, 4   ;;  %s1438_s12 = smov %s1192_s13 }
 0x11f   : > { %s1439_s13 = smov %s1196_s14  ;;  %s1440_s14 = smov %s1261_s21 }
 0x120   : > { %s1441_s15 = smov %s1250_s18  ;;  %15 = sbr.rel (!%p13_p2) target bundleno = 3 (0x3), region = 67 }
 0x125   :  { %761 = vsyncpa [#allocation3], 1 }
 0x126   :  { %763 = vsyncpa [#allocation3 + $0x1], 1 }

</bundles_post_ra>
